<compile_context>
chip_gen: v6e
topology: v6e:2x2x1
jax: 0.10.0
libtpu: 0.0.40
codegen_flags: <defaults>
</compile_context>

<pallas_src>
import functools
import math

import jax
import jax.numpy as jnp
from jax.experimental import pallas as pl
from jax.experimental.pallas import tpu as pltpu


_MXU_MIN_CIN = 16  # below this, an unrolled VPU MAC beats an underfilled MXU push


# ----------------------------- Pallas kernel -------------------------------

def _coord_conv1x1_kernel(x_ref, w_ref, cb_ref, o_ref, *, use_mxu):
    # x_ref : (B, Cin, HW)  f32   all batch elements, channels on sublanes
    # w_ref : (Cout, Cin)   f32   1x1-conv weight for the input channels
    # cb_ref: (Cout, HW)    f32   batch-invariant epilogue (bias + coord chans)
    # o_ref : (B, Cout, HW) f32   lane-dense output (lane axis = HW)
    B, Cin, _ = x_ref.shape
    w = w_ref[...]
    cb = cb_ref[...]
    for b in range(B):                      # static unroll, B is small
        xb = x_ref[b]                       # (Cin, HW)
        if use_mxu:
            y = cb + jnp.dot(w, xb, preferred_element_type=jnp.float32)
        else:
            # Cin-step outer-product multiply-accumulate on the VPU: exact f32
            # and avoids MXU pipeline-fill / result-pop cost at tiny K=Cin.
            y = cb
            for c in range(Cin):
                y = y + w[:, c:c + 1] * xb[c:c + 1, :]
        o_ref[b] = y.astype(o_ref.dtype)


# ------------------------------- wrapper ------------------------------------

@functools.partial(jax.jit, static_argnames=("coord", "with_r"))
def coord_forward(x, w_in, w_coord, b, *, coord=True, with_r=False):
    """x: (B, Cin, H, W) NCHW f32. Returns (B, Cout, H, W) f32."""
    B, Cin, H, W = x.shape
    Cout = w_in.shape[0]
    HW = H * W
    # Flatten spatial dims onto the lane axis (free metadata reshape, no cast).
    x_flat = x.reshape(B, Cin, HW)

    # Batch-invariant epilogue: bias + coordinate-channel contributions.
    # Tiny (Cout x HW) — computed once in the wrapper, never per grid step.
    cb = jnp.broadcast_to(b.reshape(Cout, 1), (Cout, HW)).astype(jnp.float32)
    if coord:
        # Static guard: PyTorch divides by zero for H==1 / W==1 (degenerate).
        xi = jnp.arange(H, dtype=jnp.float32) * (2.0 / max(H - 1, 1)) - 1.0
        yj = jnp.arange(W, dtype=jnp.float32) * (2.0 / max(W - 1, 1)) - 1.0
        xx = jnp.broadcast_to(xi[:, None], (H, W)).reshape(1, HW)   # varies dim 2
        yy = jnp.broadcast_to(yj[None, :], (H, W)).reshape(1, HW)   # varies dim 3
        cb = cb + w_coord[:, 0:1] * xx + w_coord[:, 1:2] * yy
        if with_r:
            rr = jnp.sqrt((xx - 0.5) ** 2 + (yy - 0.5) ** 2)
            cb = cb + w_coord[:, 2:3] * rr

    kern = functools.partial(_coord_conv1x1_kernel,
                             use_mxu=(Cin >= _MXU_MIN_CIN))
    out = pl.pallas_call(
        kern,
        out_shape=jax.ShapeDtypeStruct((B, Cout, HW), jnp.float32),
        grid=(1,),  # single fat step: everything fits VMEM, no per-step overhead
        in_specs=[
            pl.BlockSpec((B, Cin, HW), lambda i: (0, 0, 0)),
            pl.BlockSpec((Cout, Cin), lambda i: (0, 0)),
            pl.BlockSpec((Cout, HW), lambda i: (0, 0)),
        ],
        out_specs=pl.BlockSpec((B, Cout, HW), lambda i: (0, 0, 0)),
    )(x_flat, w_in.astype(jnp.float32), cb)
    return out.reshape(B, Cout, H, W)


# --------------------------- pure-JAX reference -----------------------------

def coord_ref(x, w_full, b, *, coord=True, with_r=False):
    """Direct translation of the PyTorch module (f32), for verification."""
    B, C, H, W = x.shape
    if coord:
        xx = (jnp.arange(H, dtype=jnp.float32) / (H - 1)) * 2.0 - 1.0
        yy = (jnp.arange(W, dtype=jnp.float32) / (W - 1)) * 2.0 - 1.0
        xx_c = jnp.broadcast_to(xx[None, None, :, None], (B, 1, H, W))
        yy_c = jnp.broadcast_to(yy[None, None, None, :], (B, 1, H, W))
        feats = [x, xx_c, yy_c]
        if with_r:
            feats.append(jnp.sqrt((xx_c - 0.5) ** 2 + (yy_c - 0.5) ** 2))
        xin = jnp.concatenate(feats, axis=1)
    else:
        xin = x
    y = jnp.einsum('oc,bchw->bohw', w_full, xin,
                   precision=jax.lax.Precision.HIGHEST)
    return y + b[None, :, None, None]


# --------------------------------- main --------------------------------------

if __name__ == "__main__":
    B, Cin, H, W = 2, 4, 16, 16
    Cout = 8
    coord, with_r = True, False                    # module defaults

    key = jax.random.PRNGKey(0)
    kx, kw, kb = jax.random.split(key, 3)
    x = jax.random.normal(kx, (B, Cin, H, W), jnp.float32)

    in_size = Cin + (2 if coord else 0) + (1 if (coord and with_r) else 0)
    bound = 1.0 / math.sqrt(in_size)               # Conv2d(k=1) default init range
    w_full = jax.random.uniform(kw, (Cout, in_size), jnp.float32, -bound, bound)
    b = jax.random.uniform(kb, (Cout,), jnp.float32, -bound, bound)

    # Split the 1x1-conv weight: input-channel part vs coord part (epilogue).
    # PyTorch concat order is [input, xx, yy, (rr)] -> columns Cin, Cin+1, Cin+2.
    w_in = w_full[:, :Cin]
    w_coord = jnp.zeros((Cout, 3), jnp.float32)
    if coord:
        w_coord = w_coord.at[:, 0].set(w_full[:, Cin])        # xx (varies along H)
        w_coord = w_coord.at[:, 1].set(w_full[:, Cin + 1])    # yy (varies along W)
        if with_r:
            w_coord = w_coord.at[:, 2].set(w_full[:, Cin + 2])  # rr

    out = coord_forward(x, w_in, w_coord, b, coord=coord, with_r=with_r)
    out = jax.block_until_ready(out)

    assert out.shape == (B, Cout, H, W), out.shape
    assert bool(jnp.all(jnp.isfinite(out)))
    ref = coord_ref(x, w_full, b, coord=coord, with_r=with_r)
    max_err = float(jnp.max(jnp.abs(out - ref)))
    assert bool(jnp.allclose(out, ref, atol=1e-4, rtol=1e-4)), max_err
    print("KERNEL_OK")
</pallas_src>

<mosaic_0001>
module attributes {stable_mosaic.version = 11 : i64} {
  func.func @_coord_conv1x1_kernel(%arg0: i32, %arg1: memref<2x4x256xf32, #tpu.memory_space<vmem>>, %arg2: memref<8x4xf32, #tpu.memory_space<vmem>>, %arg3: memref<8x256xf32, #tpu.memory_space<vmem>>, %arg4: memref<2x8x256xf32, #tpu.memory_space<vmem>>) attributes {dimension_semantics = [#tpu.dimension_semantics<arbitrary>], iteration_bounds = array<i64: 1>, scalar_prefetch = 0 : i64, scratch_operands = 0 : i64, tpu.core_type = #tpu.core_type<tc>, window_params = [{pipeline_mode = #tpu.pipeline_mode<synchronous>, transform_indices = @transform_0, window_bounds = array<i64: 2, 4, 256>}, {pipeline_mode = #tpu.pipeline_mode<synchronous>, transform_indices = @transform_1, window_bounds = array<i64: 8, 4>}, {pipeline_mode = #tpu.pipeline_mode<synchronous>, transform_indices = @transform_2, window_bounds = array<i64: 8, 256>}, {pipeline_mode = #tpu.pipeline_mode<synchronous>, transform_indices = @transform_3, window_bounds = array<i64: 2, 8, 256>}]} {
    %c0 = arith.constant 0 : index
    %c0_0 = arith.constant 0 : index
    %0 = vector.load %arg2[%c0, %c0_0] : memref<8x4xf32, #tpu.memory_space<vmem>>, vector<8x4xf32>
    %c0_1 = arith.constant 0 : index
    %c0_2 = arith.constant 0 : index
    %1 = vector.load %arg3[%c0_1, %c0_2] : memref<8x256xf32, #tpu.memory_space<vmem>>, vector<8x256xf32>
    %c0_3 = arith.constant 0 : index
    %c0_4 = arith.constant 0 : index
    %c0_5 = arith.constant 0 : index
    %2 = vector.load %arg1[%c0_3, %c0_4, %c0_5] : memref<2x4x256xf32, #tpu.memory_space<vmem>>, vector<1x4x256xf32>
    %3 = vector.shape_cast %2 : vector<1x4x256xf32> to vector<4x256xf32>
    %4 = vector.extract_strided_slice %0 {offsets = [0, 0], sizes = [8, 1], strides = [1, 1]} : vector<8x4xf32> to vector<8x1xf32>
    %5 = vector.extract_strided_slice %3 {offsets = [0, 0], sizes = [1, 256], strides = [1, 1]} : vector<4x256xf32> to vector<1x256xf32>
    %6 = vector.broadcast %4 : vector<8x1xf32> to vector<8x256xf32>
    %7 = vector.broadcast %5 : vector<1x256xf32> to vector<8x256xf32>
    %8 = arith.mulf %6, %7 : vector<8x256xf32>
    %9 = arith.addf %1, %8 : vector<8x256xf32>
    %10 = vector.extract_strided_slice %0 {offsets = [0, 1], sizes = [8, 1], strides = [1, 1]} : vector<8x4xf32> to vector<8x1xf32>
    %11 = vector.extract_strided_slice %3 {offsets = [1, 0], sizes = [1, 256], strides = [1, 1]} : vector<4x256xf32> to vector<1x256xf32>
    %12 = vector.broadcast %10 : vector<8x1xf32> to vector<8x256xf32>
    %13 = vector.broadcast %11 : vector<1x256xf32> to vector<8x256xf32>
    %14 = arith.mulf %12, %13 : vector<8x256xf32>
    %15 = arith.addf %9, %14 : vector<8x256xf32>
    %16 = vector.extract_strided_slice %0 {offsets = [0, 2], sizes = [8, 1], strides = [1, 1]} : vector<8x4xf32> to vector<8x1xf32>
    %17 = vector.extract_strided_slice %3 {offsets = [2, 0], sizes = [1, 256], strides = [1, 1]} : vector<4x256xf32> to vector<1x256xf32>
    %18 = vector.broadcast %16 : vector<8x1xf32> to vector<8x256xf32>
    %19 = vector.broadcast %17 : vector<1x256xf32> to vector<8x256xf32>
    %20 = arith.mulf %18, %19 : vector<8x256xf32>
    %21 = arith.addf %15, %20 : vector<8x256xf32>
    %22 = vector.extract_strided_slice %0 {offsets = [0, 3], sizes = [8, 1], strides = [1, 1]} : vector<8x4xf32> to vector<8x1xf32>
    %23 = vector.extract_strided_slice %3 {offsets = [3, 0], sizes = [1, 256], strides = [1, 1]} : vector<4x256xf32> to vector<1x256xf32>
    %24 = vector.broadcast %22 : vector<8x1xf32> to vector<8x256xf32>
    %25 = vector.broadcast %23 : vector<1x256xf32> to vector<8x256xf32>
    %26 = arith.mulf %24, %25 : vector<8x256xf32>
    %27 = arith.addf %21, %26 : vector<8x256xf32>
    %c0_6 = arith.constant 0 : index
    %c0_7 = arith.constant 0 : index
    %c0_8 = arith.constant 0 : index
    %28 = vector.load %arg4[%c0_6, %c0_7, %c0_8] : memref<2x8x256xf32, #tpu.memory_space<vmem>>, vector<1x8x256xf32>
    %29 = vector.shape_cast %28 : vector<1x8x256xf32> to vector<8x256xf32>
    %30 = vector.shape_cast %27 : vector<8x256xf32> to vector<1x8x256xf32>
    tpu.vector_store %arg4[%c0_6, %c0_7, %c0_8], %30 {strides = array<i32>} : memref<2x8x256xf32, #tpu.memory_space<vmem>>, vector<1x8x256xf32>,
    %c1 = arith.constant 1 : index
    %c0_9 = arith.constant 0 : index
    %c0_10 = arith.constant 0 : index
    %31 = vector.load %arg1[%c1, %c0_9, %c0_10] : memref<2x4x256xf32, #tpu.memory_space<vmem>>, vector<1x4x256xf32>
    %32 = vector.shape_cast %31 : vector<1x4x256xf32> to vector<4x256xf32>
    %33 = vector.extract_strided_slice %0 {offsets = [0, 0], sizes = [8, 1], strides = [1, 1]} : vector<8x4xf32> to vector<8x1xf32>
    %34 = vector.extract_strided_slice %32 {offsets = [0, 0], sizes = [1, 256], strides = [1, 1]} : vector<4x256xf32> to vector<1x256xf32>
    %35 = vector.broadcast %33 : vector<8x1xf32> to vector<8x256xf32>
    %36 = vector.broadcast %34 : vector<1x256xf32> to vector<8x256xf32>
    %37 = arith.mulf %35, %36 : vector<8x256xf32>
    %38 = arith.addf %1, %37 : vector<8x256xf32>
    %39 = vector.extract_strided_slice %0 {offsets = [0, 1], sizes = [8, 1], strides = [1, 1]} : vector<8x4xf32> to vector<8x1xf32>
    %40 = vector.extract_strided_slice %32 {offsets = [1, 0], sizes = [1, 256], strides = [1, 1]} : vector<4x256xf32> to vector<1x256xf32>
    %41 = vector.broadcast %39 : vector<8x1xf32> to vector<8x256xf32>
    %42 = vector.broadcast %40 : vector<1x256xf32> to vector<8x256xf32>
    %43 = arith.mulf %41, %42 : vector<8x256xf32>
    %44 = arith.addf %38, %43 : vector<8x256xf32>
    %45 = vector.extract_strided_slice %0 {offsets = [0, 2], sizes = [8, 1], strides = [1, 1]} : vector<8x4xf32> to vector<8x1xf32>
    %46 = vector.extract_strided_slice %32 {offsets = [2, 0], sizes = [1, 256], strides = [1, 1]} : vector<4x256xf32> to vector<1x256xf32>
    %47 = vector.broadcast %45 : vector<8x1xf32> to vector<8x256xf32>
    %48 = vector.broadcast %46 : vector<1x256xf32> to vector<8x256xf32>
    %49 = arith.mulf %47, %48 : vector<8x256xf32>
    %50 = arith.addf %44, %49 : vector<8x256xf32>
    %51 = vector.extract_strided_slice %0 {offsets = [0, 3], sizes = [8, 1], strides = [1, 1]} : vector<8x4xf32> to vector<8x1xf32>
    %52 = vector.extract_strided_slice %32 {offsets = [3, 0], sizes = [1, 256], strides = [1, 1]} : vector<4x256xf32> to vector<1x256xf32>
    %53 = vector.broadcast %51 : vector<8x1xf32> to vector<8x256xf32>
    %54 = vector.broadcast %52 : vector<1x256xf32> to vector<8x256xf32>
    %55 = arith.mulf %53, %54 : vector<8x256xf32>
    %56 = arith.addf %50, %55 : vector<8x256xf32>
    %c1_11 = arith.constant 1 : index
    %c0_12 = arith.constant 0 : index
    %c0_13 = arith.constant 0 : index
    %57 = vector.load %arg4[%c1_11, %c0_12, %c0_13] : memref<2x8x256xf32, #tpu.memory_space<vmem>>, vector<1x8x256xf32>
    %58 = vector.shape_cast %57 : vector<1x8x256xf32> to vector<8x256xf32>
    %59 = vector.shape_cast %56 : vector<8x256xf32> to vector<1x8x256xf32>
    tpu.vector_store %arg4[%c1_11, %c0_12, %c0_13], %59 {strides = array<i32>} : memref<2x8x256xf32, #tpu.memory_space<vmem>>, vector<1x8x256xf32>,
    return
  }
  func.func @transform_0(%arg0: i32) -> (i32, i32, i32) {
    %c0_i32 = arith.constant 0 : i32
    %c0_i32_0 = arith.constant 0 : i32
    %c0_i32_1 = arith.constant 0 : i32
    %c0_i32_2 = arith.constant 0 : i32
    return %c0_i32, %c0_i32_0, %c0_i32_1 : i32, i32, i32
  }
  func.func @transform_1(%arg0: i32) -> (i32, i32) {
    %c0_i32 = arith.constant 0 : i32
    %c0_i32_0 = arith.constant 0 : i32
    %c0_i32_1 = arith.constant 0 : i32
    return %c0_i32, %c0_i32_0 : i32, i32
  }
  func.func @transform_2(%arg0: i32) -> (i32, i32) {
    %c0_i32 = arith.constant 0 : i32
    %c0_i32_0 = arith.constant 0 : i32
    %c0_i32_1 = arith.constant 0 : i32
    return %c0_i32, %c0_i32_0 : i32, i32
  }
  func.func @transform_3(%arg0: i32) -> (i32, i32, i32) {
    %c0_i32 = arith.constant 0 : i32
    %c0_i32_0 = arith.constant 0 : i32
    %c0_i32_1 = arith.constant 0 : i32
    %c0_i32_2 = arith.constant 0 : i32
    return %c0_i32, %c0_i32_0, %c0_i32_1 : i32, i32, i32
  }
}

</mosaic_0001>

<bundles_post_ra>
// kernel: mul.29
= control target key start
LH: loop header
LB: loop body
LE: loop exit
PB: predicated region body
PF: predicated region fallthrough
CT: control target
= control target key end

     0   :  { %s7_s6 = smov 3  ;;  %s21_s9 = smov 3  ;;  %vm4_vm0 = vcmask 130048   ;;  %vm11_vm1 = vcmask 1048448   ;;  %vm18_vm2 = vcmask 917248   ;;  %vm25_vm3 = vcmask 786048   ;;  %s121_s0 = inlined_call_operand.vmem [shape: f32[16,16], index: 0, kind: input, shape index: {}]   ;;  %s122_s1 = inlined_call_operand.vmem [shape: f32[256], index: 1, kind: output, shape index: {}]  }
   0x1   :  { %v63_v0 = vld [vmem:[%s121_s0 + $0x7] ss:$8 sm:%s7_s6]   ;;  %s77_s10 = smov 112   ;;  %v65_v1 = vld [vmem:[%s121_s0 + $0x5] ss:$8 sm:%s21_s9]   ;;  %s14_s13 = smov 3 }
   0x2   :  { %9 = vrot.lane.b32.xlu0 %v63_v0, %s77_s10  ;;  %s78_s14 = smov 80   ;;  %v64_v2 = vld [vmem:[%s121_s0 + $0x6] ss:$8 sm:%s14_s13]   ;;  %s28_s17 = smov 3  ;;  %vm32_vm4 = vcmask 654848   ;;  %vm39_vm5 = vcmask 523648  }
   0x3   :  { %23 = vrot.lane.b32.xlu1 %v65_v1, %s78_s14  ;;  %v66_v3 = vld [vmem:[%s121_s0 + $0x4] ss:$8 sm:%s28_s17]   ;;  %s35_s20 = smov 3  ;;  %s42_s21 = smov 3  ;;  %vm46_vm6 = vcmask 392448   ;;  %vm53_vm7 = vcmask 261248  }
   0x4   :  { %s79_s22 = smov 96   ;;  %s80_s23 = smov 64   ;;  %v67_v4 = vld [vmem:[%s121_s0 + $0x3] ss:$8 sm:%s35_s20]   ;;  %v68_v5 = vld [vmem:[%s121_s0 + $0x2] ss:$8 sm:%s42_s21]  }
   0x5   :  { %s2_s26 = smov 3  ;;  %s49_s29 = smov 3 }
   0x6   :  { %16 = vrot.lane.b32.xlu0 %v64_v2, %s79_s22  ;;  %v3_v6 = vld [vmem:[%s121_s0] ss:$8 sm:%s2_s26]   ;;  %s81_s3 = smov 48   ;;  %s82_s4 = smov 32  }
   0x7   :  { %30 = vrot.lane.b32.xlu1 %v66_v3, %s80_s23  ;;  %5 = vst.msk [vmem:[#allocation0] sm:$0x3] %vm4_vm0, %v3_v6   ;;  %v69_v7 = vld [vmem:[%s121_s0 + $0x1] ss:$8 sm:%s49_s29]   ;;  %s83_s0 = smov 16  }
   0xa   :  { %37 = vrot.lane.b32.xlu0 %v67_v4, %s81_s3 }
   0xb   :  { %44 = vrot.lane.b32.xlu1 %v68_v5, %s82_s4 }
   0xe   :  { %51 = vrot.lane.b32.xlu0 %v69_v7, %s83_s0 }
  0x74   :  { %v10_v8 = vpop.permute.xlu0 %9  }
  0x75   :  { %12 = vst.msk [vmem:[#allocation0] sm:$0x3] %vm11_vm1, %v10_v8   ;;  %v24_v9 = vpop.permute.xlu1 %23  }
  0x78   :  { %v17_v10 = vpop.permute.xlu0 %16  }
  0x79   :  { %19 = vst.msk [vmem:[#allocation0] sm:$0x3] %vm18_vm2, %v17_v10   ;;  %v31_v11 = vpop.permute.xlu1 %30  }
  0x7a   :  { %26 = vst.msk [vmem:[#allocation0] sm:$0x3] %vm25_vm3, %v24_v9  }
  0x7b   :  { %33 = vst.msk [vmem:[#allocation0] sm:$0x3] %vm32_vm4, %v31_v11  }
  0x7c   :  { %v38_v12 = vpop.permute.xlu0 %37  }
  0x7d   :  { %40 = vst.msk [vmem:[#allocation0] sm:$0x3] %vm39_vm5, %v38_v12   ;;  %v45_v13 = vpop.permute.xlu1 %44  }
  0x7e   :  { %47 = vst.msk [vmem:[#allocation0] sm:$0x3] %vm46_vm6, %v45_v13  }
  0x80   :  { %v52_v14 = vpop.permute.xlu0 %51  }
  0x81   :  { %54 = vst.msk [vmem:[#allocation0] sm:$0x3] %vm53_vm7, %v52_v14  }
  0x88   :  { %v59_v15 = vld [vmem:[#allocation0] sm:$0x3] }
  0x89   :  { %62 = vst [vmem:[%s122_s1] sm:$0x3] %v59_v15 }

// kernel: coord_forward.1
= control target key start
LH: loop header
LB: loop body
LE: loop exit
PB: predicated region body
PF: predicated region fallthrough
CT: control target
= control target key end

     0   :  { %v236_v0 = vmov 0   ;;  %v237_v2 = vmov 2   ;;  %v238_v3 = vmov 1   ;;  %v239_v4 = vmov 3   ;;  %s287_s1 = inlined_call_operand.vmem [shape: f32[8,4], index: 1, kind: input, shape index: {}]   ;;  %s288_s0 = inlined_call_operand.vmem [shape: f32[2,4,256], index: 0, kind: input, shape index: {}]   ;;  %s289_s2 = inlined_call_operand.vmem [shape: f32[8,256], index: 2, kind: input, shape index: {}]   ;;  %s290_s3 = inlined_call_operand.vmem [shape: f32[2,8,256], index: 3, kind: output, shape index: {}]  }
   0x1   :  { %231 = vset.pattern.permute.xlu0 %v236_v0  ;;  %v14_v1 = vld [vmem:[%s287_s1] sm:$0xff]  ;;  %233 = vset.pattern.permute.xlu1 %v237_v2  ;;  %v24_v5 = vlaneseq  ;;  %v224_v10 = vld [vmem:[%s288_s0 + $0x8] sm:$0xff] }
   0x2   :  { %20 = vperm.xlu0 %231, %v14_v1   ;;  %73 = vperm.xlu1 %233, %v14_v1   ;;  %v17_v9 = vld [vmem:[%s288_s0] sm:$0xff]  ;;  %v16_v48 = vld [vmem:[%s289_s2 + $0x8] sm:$0xff] }
   0x3   :  { %v25_v6 = vshrl.u32 %v24_v5, 7  ;;  %v15_v47 = vld [vmem:[%s289_s2] sm:$0xff] }
   0x5   :  { %v26_v7 = vsub.s32 0, %v25_v6  ;;  %v30_v8 = vsub.s32 4, %v25_v6  ;;  %v78_v11 = vsub.s32 2, %v25_v6  ;;  %v82_v12 = vsub.s32 6, %v25_v6 }
   0x6   :  { %232 = vset.pattern.permute.xlu0 %v238_v3  ;;  %234 = vset.pattern.permute.xlu1 %v239_v4  ;;  %v52_v17 = vsub.s32 1, %v25_v6  ;;  %v56_v18 = vsub.s32 5, %v25_v6  ;;  %v104_v19 = vsub.s32 3, %v25_v6  ;;  %v108_v20 = vsub.s32 7, %v25_v6 }
   0x7   :  { %47 = vperm.xlu0 %232, %v14_v1   ;;  %99 = vperm.xlu1 %234, %v14_v1   ;;  %v27_v13 = vrot.slane %v17_v9, %v26_v7  ;;  %v31_v14 = vrot.slane %v17_v9, %v30_v8  ;;  %v132_v15 = vrot.slane %v224_v10, %v26_v7 }
   0x8   :  { %v136_v16 = vrot.slane %v224_v10, %v30_v8  ;;  %v79_v21 = vrot.slane %v17_v9, %v78_v11  ;;  %v83_v22 = vrot.slane %v17_v9, %v82_v12  ;;  %v176_v23 = vrot.slane %v224_v10, %v78_v11 }
   0x9   :  { %v180_v24 = vrot.slane %v224_v10, %v82_v12  ;;  %v37_v25 = vrot.slane %v27_v13, %v26_v7  ;;  %v41_v26 = vrot.slane %v31_v14, %v26_v7  ;;  %v142_v27 = vrot.slane %v132_v15, %v26_v7 }
   0xa   :  { %v146_v28 = vrot.slane %v136_v16, %v26_v7  ;;  %v53_v29 = vrot.slane %v17_v9, %v52_v17  ;;  %v57_v30 = vrot.slane %v17_v9, %v56_v18  ;;  %v154_v31 = vrot.slane %v224_v10, %v52_v17 }
   0xb   :  { %235 = vset.pattern.permute.xlu0 %v239_v4  ;;  %v158_v32 = vrot.slane %v224_v10, %v56_v18  ;;  %v105_v33 = vrot.slane %v17_v9, %v104_v19  ;;  %v109_v34 = vrot.slane %v17_v9, %v108_v20  ;;  %v198_v35 = vrot.slane %v224_v10, %v104_v19 }
   0xc   :  { %v202_v36 = vrot.slane %v224_v10, %v108_v20  ;;  %v89_v39 = vrot.slane %v79_v21, %v78_v11  ;;  %v93_v40 = vrot.slane %v83_v22, %v78_v11  ;;  %v186_v41 = vrot.slane %v176_v23, %v78_v11 }
   0xd   :  { %v190_v42 = vrot.slane %v180_v24, %v78_v11  ;;  %v63_v49 = vrot.slane %v53_v29, %v52_v17  ;;  %v67_v50 = vrot.slane %v57_v30, %v52_v17  ;;  %v164_v51 = vrot.slane %v154_v31, %v52_v17 }
   0xe   :  { %v168_v52 = vrot.slane %v158_v32, %v52_v17  ;;  %v115_v53 = vrot.slane %v105_v33, %v104_v19  ;;  %v119_v54 = vrot.slane %v109_v34, %v104_v19  ;;  %v208_v55 = vrot.slane %v198_v35, %v104_v19 }
   0xf   :  { %v212_v56 = vrot.slane %v202_v36, %v104_v19 }
  0x7d   :  { %v21_v37 = vpop.permute.xlu0 %20  ;;  %v74_v38 = vpop.permute.xlu1 %73 }
  0x7e   :  { %v42_v43 = vmul.f32 %v37_v25, %v21_v37  ;;  %v43_v44 = vmul.f32 %v41_v26, %v21_v37  ;;  %v147_v45 = vmul.f32 %v142_v27, %v21_v37  ;;  %v148_v46 = vmul.f32 %v146_v28, %v21_v37 }
  0x7f   :  { %v94_v57 = vmul.f32 %v89_v39, %v74_v38  ;;  %v95_v58 = vmul.f32 %v93_v40, %v74_v38  ;;  %v191_v59 = vmul.f32 %v186_v41, %v74_v38  ;;  %v192_v60 = vmul.f32 %v190_v42, %v74_v38 }
  0x80   :  { %v44_v62 = vadd.f32 %v42_v43, %v15_v47  ;;  %v45_v63 = vadd.f32 %v43_v44, %v16_v48  ;;  %v149_v0 = vadd.f32 %v147_v45, %v15_v47  ;;  %v150_v1 = vadd.f32 %v148_v46, %v16_v48 }
  0x82   :  { %v48_v61 = vpop.permute.xlu0 %47  ;;  %v100_v2 = vpop.permute.xlu1 %99 }
  0x83   :  { %v68_v3 = vmul.f32 %v63_v49, %v48_v61  ;;  %v69_v4 = vmul.f32 %v67_v50, %v48_v61  ;;  %v169_v5 = vmul.f32 %v164_v51, %v48_v61  ;;  %v170_v6 = vmul.f32 %v168_v52, %v48_v61 }
  0x84   :  { %v120_v7 = vmul.f32 %v115_v53, %v100_v2  ;;  %v121_v8 = vmul.f32 %v119_v54, %v100_v2  ;;  %v213_v9 = vmul.f32 %v208_v55, %v100_v2  ;;  %v214_v10 = vmul.f32 %v212_v56, %v100_v2 }
  0x85   :  { %v70_v11 = vadd.f32 %v68_v3, %v44_v62  ;;  %v71_v12 = vadd.f32 %v69_v4, %v45_v63  ;;  %v171_v13 = vadd.f32 %v169_v5, %v149_v0  ;;  %v172_v14 = vadd.f32 %v170_v6, %v150_v1 }
  0x87   :  { %v96_v15 = vadd.f32 %v94_v57, %v70_v11  ;;  %v97_v16 = vadd.f32 %v95_v58, %v71_v12  ;;  %v193_v17 = vadd.f32 %v191_v59, %v171_v13  ;;  %v194_v18 = vadd.f32 %v192_v60, %v172_v14 }
  0x89   :  { %v122_v19 = vadd.f32 %v120_v7, %v96_v15  ;;  %v123_v20 = vadd.f32 %v121_v8, %v97_v16  ;;  %v215_v21 = vadd.f32 %v213_v9, %v193_v17  ;;  %v216_v22 = vadd.f32 %v214_v10, %v194_v18 }
  0x8b   :  { %124 = vst [vmem:[%s290_s3] sm:$0xff] %v122_v19  ;;  %125 = vst [vmem:[%s290_s3 + $0x8] sm:$0xff] %v123_v20 }
  0x8c   :  { %225 = vst [vmem:[%s290_s3 + $0x10] sm:$0xff] %v215_v21  ;;  %226 = vst [vmem:[%s290_s3 + $0x18] sm:$0xff] %v216_v22 }

</bundles_post_ra>
